<compile_context>
chip_gen: v7x
topology: tpu7x:2x2x1
jax: 0.10.0
libtpu: 0.0.40
codegen_flags: <defaults>
</compile_context>

<pallas_src>
import functools
import math

import jax
import jax.numpy as jnp
from jax import lax
from jax.experimental import pallas as pl
from jax.experimental.pallas import tpu as pltpu

# ----------------------------- config ---------------------------------------
C0, C1 = 32, 64          # UNet channel widths
GROUPS = 8               # GroupNorm groups
TEMB = 128               # time embedding dim
LATENT_C = 4             # latent channels
PROMPT_DIM = 32          # per-encoder prompt dim
ENC_DIM = 2 * PROMPT_DIM # concat(prompt_embd, prompt_embd_2)
PROMPT_LEN = 8
ACT_DTYPE = jnp.bfloat16 # inter-kernel activation dtype in HBM
EPS = 1e-5


def _ru(x, n):
    return ((x + n - 1) // n) * n


def _group_matrix(c, groups=GROUPS):
    """(C,C) 0/1 matrix: M[i,j]=1 iff channels i,j share a GroupNorm group."""
    grp = jnp.arange(c) // (c // groups)
    return (grp[:, None] == grp[None, :]).astype(jnp.float32)


def _gn_stats(x, gm_ref, inv_count):
    """Per-channel (broadcast) group mean/var for x:(C,L) f32.  Padding
    positions must hold exact zeros (they don't perturb the sums) and are
    excluded from inv_count.  Group reduction is a tiny (C,C)@(C,2) matmul so
    no sublane reshapes are needed."""
    s = jnp.sum(x, axis=1, keepdims=True)
    ss = jnp.sum(x * x, axis=1, keepdims=True)
    gs = jnp.dot(gm_ref[...], jnp.concatenate([s, ss], axis=1),
                 preferred_element_type=jnp.float32)          # (C, 2)
    mean = gs[:, 0:1] * inv_count
    var = gs[:, 1:2] * inv_count - mean * mean
    return mean, var


# ====== Pallas kernel: fused [GroupNorm(+SiLU)] + conv2d (+bias +temb) =======
def _nac_kernel(*refs, gn, silu, kh, kw, wp, lout, kcat, has_temb, inv_count):
    it = iter(refs)
    x_ref = next(it)
    if gn:
        gm_ref, gam_ref, bet_ref, msk_ref = next(it), next(it), next(it), next(it)
    w_ref = next(it)
    b_ref = next(it)
    if has_temb:
        emb_ref, tw_ref = next(it), next(it)
    o_ref = next(it)

    x = x_ref[0].astype(jnp.float32)                          # (Cin, Lflat)
    if gn:
        mean, var = _gn_stats(x, gm_ref, inv_count)
        h = (x - mean) * (gam_ref[...] * lax.rsqrt(var + EPS)) + bet_ref[...]
        if silu:
            h = h * jax.nn.sigmoid(h)
        h = h * msk_ref[...]          # restore exact zeros in the conv padding
    else:
        h = x
    hb = h.astype(jnp.bfloat16)

    if kcat:
        if kh * kw > 1:
            taps = [hb[:, dy * wp + dx: dy * wp + dx + lout]
                    for dy in range(kh) for dx in range(kw)]
            rhs = jnp.concatenate(taps, axis=0)               # (kk*Cin, Lout)
        else:
            rhs = hb[:, :lout]
        acc = jnp.dot(w_ref[...], rhs, preferred_element_type=jnp.float32)
    else:
        cout = o_ref.shape[1]
        acc = jnp.zeros((cout, lout), jnp.float32)
        for dy in range(kh):
            for dx in range(kw):
                off = dy * wp + dx
                acc = acc + jnp.dot(w_ref[dy * kw + dx], hb[:, off:off + lout],
                                    preferred_element_type=jnp.float32)

    bias = b_ref[...]                                         # (Cout, 1)
    if has_temb:
        bias = bias + jnp.dot(tw_ref[...], emb_ref[0],
                              preferred_element_type=jnp.float32)   # (Cout, 1)
    o_ref[0] = (acc + bias).astype(o_ref.dtype)


def norm_act_conv(x, w, b, *, stride=1, padding=1, gn=None, silu=True,
                  emb=None, emb_w=None, out_dtype=ACT_DTYPE):
    """Fused [GroupNorm(+SiLU)] + NCHW conv2d (+bias [+in-kernel time-emb
    projection added per channel]).  One grid step per sample; the conv is a
    single K=kh*kw*Cin matmul on the flattened padded input so the output is
    produced lane-dense in NCHW order (junk columns trimmed in XLA)."""
    N, Cin, H, W = x.shape
    Cout, _, kh, kw = w.shape
    kk = kh * kw
    Hp, Wp = H + 2 * padding, W + 2 * padding
    Ho, Wo = Hp - kh + 1, Wp - kw + 1
    Lout = Ho * Wp
    Lflat = _ru(Hp * Wp + (kw - 1), 128)

    xp = x
    if padding > 0:
        xp = jnp.pad(xp, ((0, 0), (0, 0), (padding, padding), (padding, padding)))
    xf = jnp.pad(xp.reshape(N, Cin, Hp * Wp),
                 ((0, 0), (0, 0), (0, Lflat - Hp * Wp)))

    kcat = (kk == 1) or (Cin % 16 == 0)
    if kcat:
        wk_ = w.transpose(0, 2, 3, 1).reshape(Cout, kk * Cin).astype(jnp.bfloat16)
        w_spec = pl.BlockSpec((Cout, kk * Cin), lambda n: (0, 0))
    else:
        wk_ = w.transpose(2, 3, 0, 1).reshape(kk, Cout, Cin).astype(jnp.bfloat16)
        w_spec = pl.BlockSpec((kk, Cout, Cin), lambda n: (0, 0, 0))
    bias = b.reshape(Cout, 1).astype(jnp.float32)

    in_specs = [pl.BlockSpec((1, Cin, Lflat), lambda n: (n, 0, 0))]
    args = [xf]
    inv_count = 0.0
    if gn is not None:
        gamma, beta = gn
        inv_count = 1.0 / ((Cin // GROUPS) * H * W)
        ys = jnp.arange(Hp)
        xs_ = jnp.arange(Wp)
        valid = ((ys[:, None] >= padding) & (ys[:, None] < padding + H) &
                 (xs_[None, :] >= padding) & (xs_[None, :] < padding + W))
        mask = jnp.pad(valid.astype(jnp.float32).reshape(1, Hp * Wp),
                       ((0, 0), (0, Lflat - Hp * Wp)))
        in_specs += [pl.BlockSpec((Cin, Cin), lambda n: (0, 0)),
                     pl.BlockSpec((Cin, 1), lambda n: (0, 0)),
                     pl.BlockSpec((Cin, 1), lambda n: (0, 0)),
                     pl.BlockSpec((1, Lflat), lambda n: (0, 0))]
        args += [_group_matrix(Cin),
                 gamma.reshape(Cin, 1).astype(jnp.float32),
                 beta.reshape(Cin, 1).astype(jnp.float32),
                 mask]
    in_specs += [w_spec, pl.BlockSpec((Cout, 1), lambda n: (0, 0))]
    args += [wk_, bias]
    has_temb = emb is not None
    if has_temb:
        in_specs += [pl.BlockSpec((1, TEMB, 1), lambda n: (n, 0, 0)),
                     pl.BlockSpec((Cout, TEMB), lambda n: (0, 0))]
        args += [emb.reshape(N, TEMB, 1).astype(jnp.float32),
                 emb_w.T.astype(jnp.float32)]

    out = pl.pallas_call(
        functools.partial(_nac_kernel, gn=gn is not None, silu=silu, kh=kh,
                          kw=kw, wp=Wp, lout=Lout, kcat=kcat,
                          has_temb=has_temb, inv_count=inv_count),
        out_shape=jax.ShapeDtypeStruct((N, Cout, Lout), out_dtype),
        grid=(N,),
        in_specs=in_specs,
        out_specs=pl.BlockSpec((1, Cout, Lout), lambda n: (n, 0, 0)),
        compiler_params=pltpu.CompilerParams(
            dimension_semantics=("parallel",)),
    )(*args)
    out = out.reshape(N, Cout, Ho, Wp)[:, :, :, :Wo]
    if stride > 1:
        # TODO(synk): stride-2 subsampling still happens post-kernel in XLA.
        out = out[:, :, ::stride, ::stride]
    return out


# =================== Pallas kernel: standalone GroupNorm(+SiLU) ==============
# Only needed for the pano output head, where the reference computes GN on the
# *unpadded* tensor before the circular pad (so it can't be fused with the
# circular-padded conv without changing the statistics).
def _gn_kernel(x_ref, gm_ref, g_ref, b_ref, o_ref, *, inv_count, silu):
    x = x_ref[0].astype(jnp.float32)                          # (C, HW)
    mean, var = _gn_stats(x, gm_ref, inv_count)
    y = (x - mean) * (g_ref[...] * lax.rsqrt(var + EPS)) + b_ref[...]
    if silu:
        y = y * jax.nn.sigmoid(y)
    o_ref[0] = y.astype(o_ref.dtype)


def group_norm(x, gamma, beta, silu=True, out_dtype=ACT_DTYPE):
    N, C, H, W = x.shape
    xr = x.reshape(N, C, H * W)
    out = pl.pallas_call(
        functools.partial(_gn_kernel, inv_count=1.0 / ((C // GROUPS) * H * W),
                          silu=silu),
        out_shape=jax.ShapeDtypeStruct((N, C, H * W), out_dtype),
        grid=(N,),
        in_specs=[pl.BlockSpec((1, C, H * W), lambda n: (n, 0, 0)),
                  pl.BlockSpec((C, C), lambda n: (0, 0)),
                  pl.BlockSpec((C, 1), lambda n: (0, 0)),
                  pl.BlockSpec((C, 1), lambda n: (0, 0))],
        out_specs=pl.BlockSpec((1, C, H * W), lambda n: (n, 0, 0)),
        compiler_params=pltpu.CompilerParams(
            dimension_semantics=("parallel",)),
    )(xr, _group_matrix(C), gamma.reshape(C, 1).astype(jnp.float32),
      beta.reshape(C, 1).astype(jnp.float32))
    return out.reshape(N, C, H, W)


# ======= Pallas kernel: fused cross-attention transformer block (1 call) =====
def _attn_block_kernel(x_ref, enc_ref, gm_ref, g_ref, bt_ref, wq_ref, wkv_ref,
                       wo_ref, bo_ref, o_ref, *, inv_count, scale, c):
    x = x_ref[0].astype(jnp.float32)                          # (C, HW)
    mean, var = _gn_stats(x, gm_ref, inv_count)
    h = (x - mean) * (g_ref[...] * lax.rsqrt(var + EPS)) + bt_ref[...]
    hb = h.astype(jnp.bfloat16)

    q_t = jnp.dot(wq_ref[...], hb,
                  preferred_element_type=jnp.float32)          # (C, HW)
    enc = enc_ref[0].astype(jnp.bfloat16)                      # (L, E)
    kv = jnp.dot(enc, wkv_ref[...],
                 preferred_element_type=jnp.float32)           # (L, 2C)
    k = kv[:, :c].astype(jnp.bfloat16)                         # (L, C)
    v_t = jnp.transpose(kv[:, c:]).astype(jnp.bfloat16)        # (C, L)

    s = jnp.dot(k, q_t.astype(jnp.bfloat16),
                preferred_element_type=jnp.float32) * scale    # (L, HW)
    m = jnp.max(s, axis=0, keepdims=True)
    p = jnp.exp(s - m)
    p = p * pl.reciprocal(jnp.sum(p, axis=0, keepdims=True), approx=True)

    o_t = jnp.dot(v_t, p.astype(jnp.bfloat16),
                  preferred_element_type=jnp.float32)          # (C, HW)
    out = jnp.dot(wo_ref[...], o_t.astype(jnp.bfloat16),
                  preferred_element_type=jnp.float32) + bo_ref[...]
    o_ref[0] = (x + out).astype(o_ref.dtype)


def run_attn(p, x, enc):
    """Whole cross-attention block (GN, q/kv/out projections, softmax attn,
    residual) in one pallas_call, channel-major end-to-end."""
    N, C, H, W = x.shape
    L = enc.shape[1]
    xr = x.reshape(N, C, H * W)
    wkv = jnp.concatenate([p['wk'], p['wv']], axis=1).astype(jnp.bfloat16)
    out = pl.pallas_call(
        functools.partial(_attn_block_kernel,
                          inv_count=1.0 / ((C // GROUPS) * H * W),
                          scale=1.0 / math.sqrt(C), c=C),
        out_shape=jax.ShapeDtypeStruct((N, C, H * W), xr.dtype),
        grid=(N,),
        in_specs=[pl.BlockSpec((1, C, H * W), lambda n: (n, 0, 0)),
                  pl.BlockSpec((1, L, ENC_DIM), lambda n: (n, 0, 0)),
                  pl.BlockSpec((C, C), lambda n: (0, 0)),
                  pl.BlockSpec((C, 1), lambda n: (0, 0)),
                  pl.BlockSpec((C, 1), lambda n: (0, 0)),
                  pl.BlockSpec((C, C), lambda n: (0, 0)),
                  pl.BlockSpec((ENC_DIM, 2 * C), lambda n: (0, 0)),
                  pl.BlockSpec((C, C), lambda n: (0, 0)),
                  pl.BlockSpec((C, 1), lambda n: (0, 0))],
        out_specs=pl.BlockSpec((1, C, H * W), lambda n: (n, 0, 0)),
        compiler_params=pltpu.CompilerParams(
            dimension_semantics=("parallel",)),
    )(xr, enc.astype(jnp.float32), _group_matrix(C),
      p['gn_g'].reshape(C, 1).astype(jnp.float32),
      p['gn_b'].reshape(C, 1).astype(jnp.float32),
      p['wq'].T.astype(jnp.bfloat16), wkv,
      p['wo'].T.astype(jnp.bfloat16),
      p['bo'].reshape(C, 1).astype(jnp.float32))
    return out.reshape(N, C, H, W)


# ============ Pallas kernel: fused time-embedding MLP (+final SiLU) ==========
def _temb_mlp_kernel(t_ref, w1_ref, b1_ref, w2_ref, b2_ref, o_ref):
    h = jnp.dot(t_ref[...], w1_ref[...],
                preferred_element_type=jnp.float32) + b1_ref[...]
    h = h * jax.nn.sigmoid(h)
    o = jnp.dot(h, w2_ref[...],
                preferred_element_type=jnp.float32) + b2_ref[...]
    o = o * jax.nn.sigmoid(o)   # resnets consume silu(time_embedding(t))
    o_ref[...] = o


def time_embedding_silu(p, t_emb):
    M = t_emb.shape[0]
    return pl.pallas_call(
        _temb_mlp_kernel,
        out_shape=jax.ShapeDtypeStruct((M, TEMB), jnp.float32),
        grid=(1,),
        in_specs=[pl.BlockSpec((M, TEMB), lambda i: (0, 0)),
                  pl.BlockSpec((TEMB, TEMB), lambda i: (0, 0)),
                  pl.BlockSpec((1, TEMB), lambda i: (0, 0)),
                  pl.BlockSpec((TEMB, TEMB), lambda i: (0, 0)),
                  pl.BlockSpec((1, TEMB), lambda i: (0, 0))],
        out_specs=pl.BlockSpec((M, TEMB), lambda i: (0, 0)),
        compiler_params=pltpu.CompilerParams(
            dimension_semantics=("arbitrary",)),
    )(t_emb.astype(jnp.float32), p['lin1_w'], p['lin1_b'].reshape(1, TEMB),
      p['lin2_w'], p['lin2_b'].reshape(1, TEMB))


# =============================== JAX glue ====================================
def pad_pano(x, pad):   # circular pad along width (equirect wrap)
    return jnp.concatenate([x[..., -pad:], x, x[..., :pad]], axis=-1)


def unpad_pano(x, pad):
    return x[..., pad:-pad]


def sinusoidal_time_proj(t, dim=TEMB, max_period=10000.0):
    half = dim // 2
    freqs = jnp.exp(-math.log(max_period) *
                    jnp.arange(half, dtype=jnp.float32) / half)
    args = jnp.asarray(t, jnp.float32)[:, None] * freqs[None, :]
    return jnp.concatenate([jnp.cos(args), jnp.sin(args)], axis=-1)


def run_resnet(p, x, emb_silu):
    # GN1+SiLU+conv1 with the temb projection and its bias folded in-kernel.
    h = norm_act_conv(x, p['conv1_w'], p['conv1_b'] + p['temb_b'],
                      padding=1, gn=(p['norm1_g'], p['norm1_b']), silu=True,
                      emb=emb_silu, emb_w=p['temb_w'])
    h = norm_act_conv(h, p['conv2_w'], p['conv2_b'],
                      padding=1, gn=(p['norm2_g'], p['norm2_b']), silu=True)
    xs = x
    if 'skip_w' in p:
        xs = norm_act_conv(x, p['skip_w'], p['skip_b'], padding=0, gn=None)
    return xs + h


def run_downsample(p, x):
    return norm_act_conv(x, p['w'], p['b'], gn=None, padding=1, stride=2)


def run_upsample(p, x):
    # TODO(synk): nearest-x2 kept as an XLA repeat; could be folded into the
    # conv as 4 parity-class 2x2 convs, but the two upsamplers are a tiny
    # fraction of this network.
    x = jnp.repeat(jnp.repeat(x, 2, axis=2), 2, axis=3)
    return norm_act_conv(x, p['w'], p['b'], gn=None, padding=1)


# ============================ parameter init =================================
class KeyGen:
    def __init__(self, key):
        self.key, self.i = key, 0

    def __call__(self):
        self.i += 1
        return jax.random.fold_in(self.key, self.i)


def _conv_init(kg, cout, cin, k):
    return (0.02 * jax.random.normal(kg(), (cout, cin, k, k), jnp.float32),
            jnp.zeros((cout,), jnp.float32))


def _lin_init(kg, din, dout):
    return (0.02 * jax.random.normal(kg(), (din, dout), jnp.float32),
            jnp.zeros((dout,), jnp.float32))


def init_resnet(kg, cin, cout):
    c1w, c1b = _conv_init(kg, cout, cin, 3)
    tw, tb = _lin_init(kg, TEMB, cout)
    c2w, c2b = _conv_init(kg, cout, cout, 3)
    p = dict(norm1_g=jnp.ones((cin,)), norm1_b=jnp.zeros((cin,)),
             conv1_w=c1w, conv1_b=c1b, temb_w=tw, temb_b=tb,
             norm2_g=jnp.ones((cout,)), norm2_b=jnp.zeros((cout,)),
             conv2_w=c2w, conv2_b=c2b)
    if cin != cout:
        sw, sb = _conv_init(kg, cout, cin, 1)
        p['skip_w'], p['skip_b'] = sw, sb
    return p


def init_attn(kg, c):
    wq, _ = _lin_init(kg, c, c)
    wk, _ = _lin_init(kg, ENC_DIM, c)
    wv, _ = _lin_init(kg, ENC_DIM, c)
    wo, bo = _lin_init(kg, c, c)
    return dict(gn_g=jnp.ones((c,)), gn_b=jnp.zeros((c,)),
                wq=wq, wk=wk, wv=wv, wo=wo, bo=bo)


def init_unet(seed):
    kg = KeyGen(jax.random.PRNGKey(seed))
    ciw, cib = _conv_init(kg, C0, LATENT_C, 3)
    l1w, l1b = _lin_init(kg, TEMB, TEMB)
    l2w, l2b = _lin_init(kg, TEMB, TEMB)
    dsw, dsb = _conv_init(kg, C0, C0, 3)
    usw, usb = _conv_init(kg, C1, C1, 3)
    cow, cob = _conv_init(kg, LATENT_C, C0, 3)
    return dict(
        conv_in_w=ciw, conv_in_b=cib,
        time_emb=dict(lin1_w=l1w, lin1_b=l1b, lin2_w=l2w, lin2_b=l2b),
        down=[dict(resnets=[init_resnet(kg, C0, C0)], down=dict(w=dsw, b=dsb)),
              dict(resnets=[init_resnet(kg, C0, C1)], down=None)],
        mid=dict(res0=init_resnet(kg, C1, C1), attn=init_attn(kg, C1),
                 res1=init_resnet(kg, C1, C1)),
        up=[dict(resnets=[init_resnet(kg, 2 * C1, C1),
                          init_resnet(kg, C1 + C0, C1)],
                 up=dict(w=usw, b=usb)),
            dict(resnets=[init_resnet(kg, C1 + C0, C0),
                          init_resnet(kg, C0 + C0, C0)],
                 up=None)],
        norm_out_g=jnp.ones((C0,)), norm_out_b=jnp.zeros((C0,)),
        conv_out_w=cow, conv_out_b=cob,
    )


# ====================== MultiViewBaseModel.forward ===========================
def multi_view_forward(unet, pano_unet, pers_latents, pano_latent, timestep,
                       pers_prompt_embd, pers_prompt_embd_2,
                       pers_pooled_prompt_embd,
                       pano_prompt_embd, pano_prompt_embd_2,
                       pano_pooled_prompt_embd,
                       add_time_ids, cameras=None,
                       pers_layout_cond=None, pano_layout_cond=None,
                       pano_pad=True):
    if isinstance(timestep, (tuple, list)):
        pers_timestep, pano_timestep = timestep
    else:
        pers_timestep = pano_timestep = jnp.asarray(timestep)
    # TODO(synk): SDXL added_cond_kwargs (add_embedding of text_embeds/time_ids)
    # not modeled in the synthetic UNet.

    # ---- perspective branch prep ----
    b, m, c, h, w = pers_latents.shape
    pers_hidden = pers_latents.reshape(b * m, c, h, w)
    _pe = pers_prompt_embd.reshape(b * m, *pers_prompt_embd.shape[2:])
    _pe2 = pers_prompt_embd_2.reshape(b * m, *pers_prompt_embd_2.shape[2:])
    pers_enc = jnp.concatenate([_pe, _pe2], axis=-1)
    _pers_pooled = pers_pooled_prompt_embd.reshape(b * m, -1)  # noqa: F841

    pers_timestep = jnp.asarray(pers_timestep)
    if pers_timestep.ndim == 0:
        _pers_t = jnp.full((b * m,), pers_timestep)
    elif pers_timestep.shape == (b,):
        _pers_t = jnp.repeat(pers_timestep, m)
    else:
        _pers_t = pers_timestep.reshape(-1)
    pers_emb_silu = time_embedding_silu(unet['time_emb'],
                                        sinusoidal_time_proj(_pers_t))

    cameras_reshaped = None if cameras is None else {
        k: v.reshape((b * m,) + v.shape[2:]) for k, v in cameras.items()}
    del cameras_reshaped  # WarpAttn blocks skipped (cameras is None here)

    # ---- pano branch prep ----
    pano_b, pano_m = pano_latent.shape[0], pano_latent.shape[1]
    assert pano_m == 1
    pano_hidden = pano_latent.reshape(pano_b, *pano_latent.shape[2:])
    _qe = pano_prompt_embd.reshape(pano_b, *pano_prompt_embd.shape[2:])
    _qe2 = pano_prompt_embd_2.reshape(pano_b, *pano_prompt_embd_2.shape[2:])
    pano_enc = jnp.concatenate([_qe, _qe2], axis=-1)

    pano_timestep = jnp.asarray(pano_timestep)
    if pano_timestep.ndim == 0:
        _pano_t = jnp.full((pano_b,), pano_timestep)
    else:
        _pano_t = pano_timestep.reshape(-1)
    pano_emb_silu = time_embedding_silu(pano_unet['time_emb'],
                                        sinusoidal_time_proj(_pano_t))

    # ControlNet branches (pers_cn / pano_cn) are None in this config -> skipped.

    # ---- conv_in ----
    pers_hidden = norm_act_conv(pers_hidden, unet['conv_in_w'],
                                unet['conv_in_b'], gn=None, padding=1)
    if pano_pad:
        ph = pad_pano(pano_hidden, 1)
        ph = norm_act_conv(ph, pano_unet['conv_in_w'], pano_unet['conv_in_b'],
                           gn=None, padding=1)
        pano_hidden = unpad_pano(ph, 1)
    else:
        pano_hidden = norm_act_conv(pano_hidden, pano_unet['conv_in_w'],
                                    pano_unet['conv_in_b'], gn=None, padding=1)

    pers_skips = [pers_hidden]
    pano_skips = [pano_hidden]

    # ---- down blocks ----
    for i in range(len(pano_unet['down'])):
        pers_blk = unet['down'][i]
        pano_blk = pano_unet['down'][i]
        for j in range(len(pano_blk['resnets'])):
            pers_hidden = run_resnet(pers_blk['resnets'][j], pers_hidden,
                                     pers_emb_silu)
            pers_skips.append(pers_hidden)
            if pano_pad:
                pano_hidden = pad_pano(pano_hidden, 2)
            pano_hidden = run_resnet(pano_blk['resnets'][j], pano_hidden,
                                     pano_emb_silu)
            if pano_pad:
                pano_hidden = unpad_pano(pano_hidden, 2)
            pano_skips.append(pano_hidden)
        if pano_blk['down'] is not None:
            pers_hidden = run_downsample(pers_blk['down'], pers_hidden)
            pers_skips.append(pers_hidden)
            if pano_pad:
                pano_hidden = pad_pano(pano_hidden, 2)
            pano_hidden = run_downsample(pano_blk['down'], pano_hidden)
            if pano_pad:
                pano_hidden = unpad_pano(pano_hidden, 1)
            pano_skips.append(pano_hidden)
            # TODO(synk): cp_blocks_encoder WarpAttn skipped (cameras is None;
            # WarpAttn source not provided in the reference).

    # ---- mid block ----
    pers_hidden = run_resnet(unet['mid']['res0'], pers_hidden, pers_emb_silu)
    pers_hidden = run_attn(unet['mid']['attn'], pers_hidden, pers_enc)
    pers_hidden = run_resnet(unet['mid']['res1'], pers_hidden, pers_emb_silu)

    if pano_pad:
        pano_hidden = pad_pano(pano_hidden, 2)
    pano_hidden = run_resnet(pano_unet['mid']['res0'], pano_hidden,
                             pano_emb_silu)
    pano_hidden = run_attn(pano_unet['mid']['attn'], pano_hidden, pano_enc)
    pano_hidden = run_resnet(pano_unet['mid']['res1'], pano_hidden,
                             pano_emb_silu)
    if pano_pad:
        pano_hidden = unpad_pano(pano_hidden, 2)
    # TODO(synk): cp_blocks_mid WarpAttn skipped (cameras is None).

    # ---- up blocks ----
    for i in range(len(pano_unet['up'])):
        pers_blk = unet['up'][i]
        pano_blk = pano_unet['up'][i]
        n = len(pano_blk['resnets'])
        pers_res = pers_skips[-n:]
        pers_skips = pers_skips[:-n]
        pano_res = pano_skips[-n:]
        pano_skips = pano_skips[:-n]
        for j in range(n):
            pers_hidden = jnp.concatenate([pers_hidden, pers_res[-1 - j]],
                                          axis=1)
            pers_hidden = run_resnet(pers_blk['resnets'][j], pers_hidden,
                                     pers_emb_silu)
            pano_hidden = jnp.concatenate([pano_hidden, pano_res[-1 - j]],
                                          axis=1)
            if pano_pad:
                pano_hidden = pad_pano(pano_hidden, 2)
            pano_hidden = run_resnet(pano_blk['resnets'][j], pano_hidden,
                                     pano_emb_silu)
            if pano_pad:
                pano_hidden = unpad_pano(pano_hidden, 2)
        # TODO(synk): cp_blocks_decoder WarpAttn skipped (cameras is None).
        if pano_blk['up'] is not None:
            pers_hidden = run_upsample(pers_blk['up'], pers_hidden)
            if pano_pad:
                pano_hidden = pad_pano(pano_hidden, 1)
            pano_hidden = run_upsample(pano_blk['up'], pano_hidden)
            if pano_pad:
                pano_hidden = unpad_pano(pano_hidden, 2)

    # ---- output heads ----
    # pers: conv_norm_out + SiLU + conv_out fused in one kernel (no circular
    # padding, so GN statistics match the reference exactly).
    pers_sample = norm_act_conv(pers_hidden, unet['conv_out_w'],
                                unet['conv_out_b'],
                                gn=(unet['norm_out_g'], unet['norm_out_b']),
                                silu=True, padding=1, out_dtype=jnp.float32)
    pers_sample = pers_sample.reshape(b, m, *pers_sample.shape[1:])

    # pano: reference applies GN+SiLU *before* the circular pad, so keep a
    # standalone GN kernel here to preserve the statistics, then a plain conv.
    pano_sample = group_norm(pano_hidden, pano_unet['norm_out_g'],
                             pano_unet['norm_out_b'], silu=True)
    if pano_pad:
        pano_sample = pad_pano(pano_sample, 1)
    pano_sample = norm_act_conv(pano_sample, pano_unet['conv_out_w'],
                                pano_unet['conv_out_b'], gn=None, padding=1,
                                out_dtype=jnp.float32)
    if pano_pad:
        pano_sample = unpad_pano(pano_sample, 1)
    pano_sample = pano_sample.reshape(pano_b, 1, *pano_sample.shape[1:])
    return pers_sample, pano_sample


# ================================ main =======================================
if __name__ == "__main__":
    unet_params = init_unet(1)
    pano_unet_params = init_unet(2)

    key = jax.random.PRNGKey(0)
    ks = jax.random.split(key, 9)
    b, m = 2, 3
    H, W = 16, 16
    PH, PW = 16, 32

    pers_latents = jax.random.normal(ks[0], (b, m, LATENT_C, H, W), jnp.float32)
    pano_latent = jax.random.normal(ks[1], (b, 1, LATENT_C, PH, PW), jnp.float32)
    timestep = jnp.asarray(10.0, jnp.float32)
    pers_prompt_embd = jax.random.normal(ks[2], (b, m, PROMPT_LEN, PROMPT_DIM))
    pers_prompt_embd_2 = jax.random.normal(ks[3], (b, m, PROMPT_LEN, PROMPT_DIM))
    pers_pooled_prompt_embd = jax.random.normal(ks[4], (b, m, PROMPT_DIM))
    pano_prompt_embd = jax.random.normal(ks[5], (b, 1, PROMPT_LEN, PROMPT_DIM))
    pano_prompt_embd_2 = jax.random.normal(ks[6], (b, 1, PROMPT_LEN, PROMPT_DIM))
    pano_pooled_prompt_embd = jax.random.normal(ks[7], (b, 1, PROMPT_DIM))
    add_time_ids = jnp.zeros((b * m, 6), jnp.float32)

    pers_sample, pano_sample = multi_view_forward(
        unet_params, pano_unet_params,
        pers_latents, pano_latent, timestep,
        pers_prompt_embd, pers_prompt_embd_2, pers_pooled_prompt_embd,
        pano_prompt_embd, pano_prompt_embd_2, pano_pooled_prompt_embd,
        add_time_ids, cameras=None, pano_pad=True)

    jax.block_until_ready((pers_sample, pano_sample))
    assert pers_sample.shape == (b, m, LATENT_C, H, W), pers_sample.shape
    assert pano_sample.shape == (b, 1, LATENT_C, PH, PW), pano_sample.shape
    assert bool(jnp.all(jnp.isfinite(pers_sample)))
    assert bool(jnp.all(jnp.isfinite(pano_sample)))
    print("KERNEL_OK")
</pallas_src>

<mosaic_0001>
module attributes {stable_mosaic.version = 11 : i64} {
  func.func @_temb_mlp_kernel(%arg0: i32, %arg1: memref<6x128xf32, #tpu.memory_space<vmem>>, %arg2: memref<128x128xf32, #tpu.memory_space<vmem>>, %arg3: memref<1x128xf32, #tpu.memory_space<vmem>>, %arg4: memref<128x128xf32, #tpu.memory_space<vmem>>, %arg5: memref<1x128xf32, #tpu.memory_space<vmem>>, %arg6: memref<6x128xf32, #tpu.memory_space<vmem>>) attributes {dimension_semantics = [#tpu.dimension_semantics<arbitrary>], iteration_bounds = array<i64: 1>, scalar_prefetch = 0 : i64, scratch_operands = 0 : i64, tpu.core_type = #tpu.core_type<tc>, window_params = [{pipeline_mode = #tpu.pipeline_mode<synchronous>, transform_indices = @transform_0, window_bounds = array<i64: 6, 128>}, {pipeline_mode = #tpu.pipeline_mode<synchronous>, transform_indices = @transform_1, window_bounds = array<i64: 128, 128>}, {pipeline_mode = #tpu.pipeline_mode<synchronous>, transform_indices = @transform_2, window_bounds = array<i64: 1, 128>}, {pipeline_mode = #tpu.pipeline_mode<synchronous>, transform_indices = @transform_3, window_bounds = array<i64: 128, 128>}, {pipeline_mode = #tpu.pipeline_mode<synchronous>, transform_indices = @transform_4, window_bounds = array<i64: 1, 128>}, {pipeline_mode = #tpu.pipeline_mode<synchronous>, transform_indices = @transform_5, window_bounds = array<i64: 6, 128>}]} {
    %c0 = arith.constant 0 : index
    %c0_0 = arith.constant 0 : index
    %0 = vector.load %arg1[%c0, %c0_0] : memref<6x128xf32, #tpu.memory_space<vmem>>, vector<6x128xf32>
    %c0_1 = arith.constant 0 : index
    %c0_2 = arith.constant 0 : index
    %1 = vector.load %arg2[%c0_1, %c0_2] : memref<128x128xf32, #tpu.memory_space<vmem>>, vector<128x128xf32>
    %cst = arith.constant dense<0.000000e+00> : vector<6x128xf32>
    %2 = tpu.matmul %0, %1, %cst {dimension_numbers = #tpu.dot_dimension_numbers<[1], [0], [0], [1], [0, 0, 1, 1], [], []>} : vector<6x128xf32>, vector<128x128xf32>, vector<6x128xf32> -> vector<6x128xf32>
    %c0_3 = arith.constant 0 : index
    %c0_4 = arith.constant 0 : index
    %3 = vector.load %arg3[%c0_3, %c0_4] : memref<1x128xf32, #tpu.memory_space<vmem>>, vector<1x128xf32>
    %4 = vector.broadcast %3 : vector<1x128xf32> to vector<6x128xf32>
    %5 = arith.addf %2, %4 : vector<6x128xf32>
    %6 = arith.negf %5 : vector<6x128xf32>
    %7 = math.exp %6 : vector<6x128xf32>
    %cst_5 = arith.constant 1.000000e+00 : f32
    %8 = vector.broadcast %cst_5 : f32 to vector<6x128xf32>
    %9 = arith.addf %8, %7 : vector<6x128xf32>
    %10 = arith.divf %8, %9 : vector<6x128xf32>
    %11 = arith.mulf %5, %10 : vector<6x128xf32>
    %c0_6 = arith.constant 0 : index
    %c0_7 = arith.constant 0 : index
    %12 = vector.load %arg4[%c0_6, %c0_7] : memref<128x128xf32, #tpu.memory_space<vmem>>, vector<128x128xf32>
    %cst_8 = arith.constant dense<0.000000e+00> : vector<6x128xf32>
    %13 = tpu.matmul %11, %12, %cst_8 {dimension_numbers = #tpu.dot_dimension_numbers<[1], [0], [0], [1], [0, 0, 1, 1], [], []>} : vector<6x128xf32>, vector<128x128xf32>, vector<6x128xf32> -> vector<6x128xf32>
    %c0_9 = arith.constant 0 : index
    %c0_10 = arith.constant 0 : index
    %14 = vector.load %arg5[%c0_9, %c0_10] : memref<1x128xf32, #tpu.memory_space<vmem>>, vector<1x128xf32>
    %15 = vector.broadcast %14 : vector<1x128xf32> to vector<6x128xf32>
    %16 = arith.addf %13, %15 : vector<6x128xf32>
    %17 = arith.negf %16 : vector<6x128xf32>
    %18 = math.exp %17 : vector<6x128xf32>
    %cst_11 = arith.constant 1.000000e+00 : f32
    %19 = vector.broadcast %cst_11 : f32 to vector<6x128xf32>
    %20 = arith.addf %19, %18 : vector<6x128xf32>
    %21 = arith.divf %19, %20 : vector<6x128xf32>
    %22 = arith.mulf %16, %21 : vector<6x128xf32>
    %c0_12 = arith.constant 0 : index
    %c0_13 = arith.constant 0 : index
    %23 = vector.load %arg6[%c0_12, %c0_13] : memref<6x128xf32, #tpu.memory_space<vmem>>, vector<6x128xf32>
    tpu.vector_store %arg6[%c0_12, %c0_13], %22 {strides = array<i32>} : memref<6x128xf32, #tpu.memory_space<vmem>>, vector<6x128xf32>,
    return
  }
  func.func @transform_0(%arg0: i32) -> (i32, i32) {
    %c0_i32 = arith.constant 0 : i32
    %c0_i32_0 = arith.constant 0 : i32
    %c0_i32_1 = arith.constant 0 : i32
    return %c0_i32, %c0_i32_0 : i32, i32
  }
  func.func @transform_1(%arg0: i32) -> (i32, i32) {
    %c0_i32 = arith.constant 0 : i32
    %c0_i32_0 = arith.constant 0 : i32
    %c0_i32_1 = arith.constant 0 : i32
    return %c0_i32, %c0_i32_0 : i32, i32
  }
  func.func @transform_2(%arg0: i32) -> (i32, i32) {
    %c0_i32 = arith.constant 0 : i32
    %c0_i32_0 = arith.constant 0 : i32
    %c0_i32_1 = arith.constant 0 : i32
    return %c0_i32, %c0_i32_0 : i32, i32
  }
  func.func @transform_3(%arg0: i32) -> (i32, i32) {
    %c0_i32 = arith.constant 0 : i32
    %c0_i32_0 = arith.constant 0 : i32
    %c0_i32_1 = arith.constant 0 : i32
    return %c0_i32, %c0_i32_0 : i32, i32
  }
  func.func @transform_4(%arg0: i32) -> (i32, i32) {
    %c0_i32 = arith.constant 0 : i32
    %c0_i32_0 = arith.constant 0 : i32
    %c0_i32_1 = arith.constant 0 : i32
    return %c0_i32, %c0_i32_0 : i32, i32
  }
  func.func @transform_5(%arg0: i32) -> (i32, i32) {
    %c0_i32 = arith.constant 0 : i32
    %c0_i32_0 = arith.constant 0 : i32
    %c0_i32_1 = arith.constant 0 : i32
    return %c0_i32, %c0_i32_0 : i32, i32
  }
}

</mosaic_0001>

<bundles_post_ra>
// kernel: tpu_custom_call.1
= control target key start
LH: loop header
LB: loop body
LE: loop exit
PB: predicated region body
PF: predicated region fallthrough
CT: control target
= control target key end

     0   :  { %10 = vsyncpa [#allocation3], 0  ;;  %s660_s0 = inlined_call_operand.hbm [shape: f32[6,128], index: 0, kind: input, shape index: {}]   ;;  %s661_s1 = inlined_call_operand.hbm [shape: f32[128,128], index: 1, kind: input, shape index: {}]   ;;  %s662_s2 = inlined_call_operand.vmem [shape: f32[1,128], index: 2, kind: input, shape index: {}]   ;;  %s663_s3 = inlined_call_operand.hbm [shape: f32[128,128], index: 3, kind: input, shape index: {}]   ;;  %s664_s4 = inlined_call_operand.vmem [shape: f32[1,128], index: 4, kind: input, shape index: {}]   ;;  %s665_s5 = inlined_call_operand.hbm [shape: f32[6,128], index: 5, kind: output, shape index: {}]  }
   0x1   :  { %11 = vsyncpa [#allocation6], 0 }
   0x2   :  { %12 = vsyncpa [#allocation4], 0  ;;  %s545_s18 = smov [#allocation5]   ;;  %s451_s22 = scalar_lea.hbm %s661_s1, 2048 }
   0x3   :  { %s28_s19 = sshll.u32 %s545_s18, 4  ;;  %p452_p0 = scmp.ne.s32.totalorder %s661_s1, %s451_s22  ;;  %s29_s19 = int_to_ptr.vmem [resolvable:$true] %s28_s19 }
   0x4   :  { %p455_p1 = scmp.lt.u32.totalorder %s451_s22, %s661_s1 }
   0x6   :  { %p457_p2 = pnand %p455_p1, %p452_p0 }
   0x8   :  { %460 = shalt.err (!%p457_p2)
}
   0x9   :  { %s461_s27 = scalar_lea.vmem %s29_s19, 2048  ;;  %p466_p4 = scmp.lt.s32.totalorder %s29_s19, %s29_s19 }
   0xa   :  { %p462_p3 = scmp.ne.s32.totalorder %s29_s19, %s461_s27  ;;  %p467_p5 = scmp.lt.s32.totalorder %s461_s27, %s461_s27 }
   0xc   :  { %p468_p6 = por %p467_p5, %p466_p4 }
   0xe   :  { %p469_p7 = pnand %p468_p6, %p462_p3 }
  0x10   :  { %472 = shalt.err (!%p469_p7)
}
  0x11   :  { %s546_s28 = smov 128   ;;  %s547_s29 = smov 8  }
  0x12   :  { %34 = dma.hbm_to_vmem [thread:$0]  %s661_s1, 2048, %s29_s19, [#allocation6], %s546_s28, %s546_s28, %s547_s29  }
  0x13   :  { %s548_s7 = smov [#allocation2]   ;;  %s549_s9 = smov [#allocation7]  }
  0x14   :  { %s19_s8 = sshll.u32 %s548_s7, 4  ;;  %s42_s10 = sshll.u32 %s549_s9, 4  ;;  %s20_s8 = int_to_ptr.vmem [resolvable:$true] %s19_s8  ;;  %s43_s10 = int_to_ptr.vmem [resolvable:$true] %s42_s10 }
  0x15   :  { %s473_s13 = scalar_lea.hbm %s660_s0, 128 }
  0x16   :  { %p474_p8 = scmp.ne.s32.totalorder %s660_s0, %s473_s13  ;;  %p477_p9 = scmp.lt.u32.totalorder %s473_s13, %s660_s0 }
  0x18   :  { %p479_p10 = pnand %p477_p9, %p474_p8 }
  0x1a   :  { %482 = shalt.err (!%p479_p10)
}
  0x1b   :  { %s483_s1 = scalar_lea.vmem %s20_s8, 128  ;;  %p488_p12 = scmp.lt.s32.totalorder %s20_s8, %s20_s8 }
  0x1c   :  { %p484_p11 = scmp.ne.s32.totalorder %s20_s8, %s483_s1  ;;  %p489_p13 = scmp.lt.s32.totalorder %s483_s1, %s483_s1 }
  0x1e   :  { %p490_p0 = por %p489_p13, %p488_p12 }
  0x20   :  { %p491_p1 = pnand %p490_p0, %p484_p11 }
  0x22   :  { %494 = shalt.err (!%p491_p1)
}
  0x23   :  { %22 = dma.hbm_to_vmem [thread:$0]  %s660_s0, 128, %s20_s8, [#allocation3]  }
  0x24   :  { %s495_s22 = scalar_lea.hbm %s663_s3, 2048 }
  0x25   :  { %p496_p2 = scmp.ne.s32.totalorder %s663_s3, %s495_s22  ;;  %p499_p3 = scmp.lt.u32.totalorder %s495_s22, %s663_s3 }
  0x27   :  { %p501_p4 = pnand %p499_p3, %p496_p2 }
  0x29   :  { %504 = shalt.err (!%p501_p4)
}
  0x2a   :  { %s505_s27 = scalar_lea.vmem %s43_s10, 2048  ;;  %p510_p6 = scmp.lt.s32.totalorder %s43_s10, %s43_s10 }
  0x2b   :  { %p506_p5 = scmp.ne.s32.totalorder %s43_s10, %s505_s27  ;;  %p511_p7 = scmp.lt.s32.totalorder %s505_s27, %s505_s27 }
  0x2d   :  { %p512_p8 = por %p511_p7, %p510_p6 }
  0x2f   :  { %p513_p9 = pnand %p512_p8, %p506_p5 }
  0x31   :  { %516 = shalt.err (!%p513_p9)
}
  0x32   :  { %48 = dma.hbm_to_vmem [thread:$0]  %s663_s3, 2048, %s43_s10, [#allocation6], %s546_s28, %s546_s28, %s547_s29  }
  0x33   :  { %539 = dma.done.wait [#allocation3], 128  }
  0x34   :  { %540 = vsyncadd [#allocation3], 4294967168 }
  0x35   :  { %541 = dma.done.wait [#allocation6], 4096  }
  0x36   :  { %542 = vsyncadd [#allocation6], 4294963200  ;;  %v550_v0 = vmov 0.0|0.0   ;;  %vm551_vm0 = vmmov 0   ;;  %v552_v1 = vmov 0.0   ;;  %v61_v2 = vld [vmem:[#allocation5] sm:$0xff] }
  0x37   :  { %386 = vmatprep.subr.bf16.mxu0 %v550_v0  ;;  %348 = vmatprep.mubr.msk.f32.mxu0 %vm551_vm0, %v552_v1  ;;  %v62_v3 = vld [vmem:[#allocation5 + $0x8] sm:$0xff]  ;;  %v63_v4 = vld [vmem:[#allocation5 + $0x10] sm:$0xff]  ;;  %v64_v6 = vld [vmem:[#allocation5 + $0x18] sm:$0xff] }
  0x38   :  { %410 = vmatprep.subr.bf16.mxu1 %v550_v0  ;;  %383 = vmatprep.mubr.msk.f32.mxu1 %vm551_vm0, %v552_v1  ;;  %v387_v5 = vpack.c.bf16 %v62_v3, %v61_v2  ;;  %v390_v7 = vpack.c.bf16 %v64_v6, %v63_v4  ;;  %v65_v8 = vld [vmem:[#allocation5 + $0x20] sm:$0xff]  ;;  %v66_v9 = vld [vmem:[#allocation5 + $0x28] sm:$0xff]  ;;  %v67_v11 = vld [vmem:[#allocation5 + $0x30] sm:$0xff] }
  0x39   :  { %v393_v10 = vpack.c.bf16 %v66_v9, %v65_v8  ;;  %v68_v12 = vld [vmem:[#allocation5 + $0x38] sm:$0xff]  ;;  %v69_v14 = vld [vmem:[#allocation5 + $0x40] sm:$0xff]  ;;  %v70_v15 = vld [vmem:[#allocation5 + $0x48] sm:$0xff] }
  0x3a   :  { %388 = vmatpush3.bf16.msra.mxu0 %v387_v5  ;;  %v396_v13 = vpack.c.bf16 %v68_v12, %v67_v11  ;;  %v399_v16 = vpack.c.bf16 %v70_v15, %v69_v14  ;;  %v71_v17 = vld [vmem:[#allocation5 + $0x50] sm:$0xff]  ;;  %v72_v18 = vld [vmem:[#allocation5 + $0x58] sm:$0xff]  ;;  %v73_v20 = vld [vmem:[#allocation5 + $0x60] sm:$0xff] }
  0x3b   :  { %389 = vmatprep.subr.bf16.mxu0 %v550_v0  ;;  %v402_v19 = vpack.c.bf16 %v72_v18, %v71_v17  ;;  %v74_v21 = vld [vmem:[#allocation5 + $0x68] sm:$0xff]  ;;  %v75_v23 = vld [vmem:[#allocation5 + $0x70] sm:$0xff]  ;;  %v76_v24 = vld [vmem:[#allocation5 + $0x78] sm:$0xff] }
  0x3c   :  { %v405_v22 = vpack.c.bf16 %v74_v21, %v73_v20  ;;  %v408_v25 = vpack.c.bf16 %v76_v24, %v75_v23  ;;  %v60_v26 = vld [vmem:[#allocation2] sm:$0x3f]  ;;  %v161_v27 = vld [vmem:[#allocation7] sm:$0xff]  ;;  %v162_v28 = vld [vmem:[#allocation7 + $0x8] sm:$0xff] }
  0x3d   :  { %v411_v29 = vpack.c.bf16 %v162_v28, %v161_v27  ;;  %v163_v30 = vld [vmem:[#allocation7 + $0x10] sm:$0xff]  ;;  %v164_v31 = vld [vmem:[#allocation7 + $0x18] sm:$0xff]  ;;  %v165_v33 = vld [vmem:[#allocation7 + $0x20] sm:$0xff] }
  0x3e   :  { %391 = vmatpush3.bf16.msra.mxu0 %v390_v7  ;;  %v414_v32 = vpack.c.bf16 %v164_v31, %v163_v30  ;;  %v166_v34 = vld [vmem:[#allocation7 + $0x28] sm:$0xff]  ;;  %v167_v36 = vld [vmem:[#allocation7 + $0x30] sm:$0xff]  ;;  %v168_v37 = vld [vmem:[#allocation7 + $0x38] sm:$0xff] }
  0x3f   :  { %392 = vmatprep.subr.bf16.mxu0 %v550_v0  ;;  %412 = vmatpush3.bf16.msra.mxu1 %v411_v29  ;;  %v417_v35 = vpack.c.bf16 %v166_v34, %v165_v33  ;;  %v420_v38 = vpack.c.bf16 %v168_v37, %v167_v36  ;;  %v169_v39 = vld [vmem:[#allocation7 + $0x40] sm:$0xff]  ;;  %v170_v40 = vld [vmem:[#allocation7 + $0x48] sm:$0xff]  ;;  %v171_v42 = vld [vmem:[#allocation7 + $0x50] sm:$0xff] }
  0x40   :  { %413 = vmatprep.subr.bf16.mxu1 %v550_v0  ;;  %v423_v41 = vpack.c.bf16 %v170_v40, %v169_v39  ;;  %v172_v43 = vld [vmem:[#allocation7 + $0x58] sm:$0xff]  ;;  %v173_v45 = vld [vmem:[#allocation7 + $0x60] sm:$0xff]  ;;  %v174_v46 = vld [vmem:[#allocation7 + $0x68] sm:$0xff] }
  0x41   :  { %v426_v44 = vpack.c.bf16 %v172_v43, %v171_v42  ;;  %v429_v47 = vpack.c.bf16 %v174_v46, %v173_v45  ;;  %v175_v48 = vld [vmem:[#allocation7 + $0x70] sm:$0xff]  ;;  %v176_v49 = vld [vmem:[#allocation7 + $0x78] sm:$0xff] }
  0x42   :  { %394 = vmatpush3.bf16.msra.mxu0 %v393_v10  ;;  %v432_v50 = vpack.c.bf16 %v176_v49, %v175_v48  ;;  %v278_v51 = vld [vmem:[%s662_s2] ss:$0 sm:$0xff]  ;;  %s553_s2 = smov [#allocation8]  }
  0x43   :  { %395 = vmatprep.subr.bf16.mxu0 %v550_v0  ;;  %415 = vmatpush3.bf16.msra.mxu1 %v414_v32  ;;  %v280_v60 = vld [vmem:[%s664_s4] ss:$0 sm:$0xff]  ;;  %s268_s7 = sshll.u32 %s553_s2, 4  ;;  %s269_s7 = int_to_ptr.vmem [resolvable:$true] %s268_s7 }
  0x44   :  { %416 = vmatprep.subr.bf16.mxu1 %v550_v0  ;;  %s517_s8 = scalar_lea.vmem %s269_s7, 128  ;;  %p522_p11 = scmp.lt.s32.totalorder %s269_s7, %s269_s7 }
  0x45   :  { %p518_p10 = scmp.ne.s32.totalorder %s269_s7, %s517_s8  ;;  %p523_p12 = scmp.lt.s32.totalorder %s517_s8, %s517_s8 }
  0x46   :  { %397 = vmatpush3.bf16.msra.mxu0 %v396_v13 }
  0x47   :  { %398 = vmatprep.subr.bf16.mxu0 %v550_v0  ;;  %418 = vmatpush3.bf16.msra.mxu1 %v417_v35  ;;  %p524_p13 = por %p523_p12, %p522_p11 }
  0x48   :  { %419 = vmatprep.subr.bf16.mxu1 %v550_v0 }
  0x49   :  { %p525_p0 = pnand %p524_p13, %p518_p10 }
  0x4a   :  { %400 = vmatpush3.bf16.msra.mxu0 %v399_v16 }
  0x4b   :  { %401 = vmatprep.subr.bf16.mxu0 %v550_v0  ;;  %421 = vmatpush3.bf16.msra.mxu1 %v420_v38 }
  0x4c   :  { %422 = vmatprep.subr.bf16.mxu1 %v550_v0 }
  0x4e   :  { %403 = vmatpush3.bf16.msra.mxu0 %v402_v19 }
  0x4f   :  { %404 = vmatprep.subr.bf16.mxu0 %v550_v0  ;;  %424 = vmatpush3.bf16.msra.mxu1 %v423_v41 }
  0x50   :  { %425 = vmatprep.subr.bf16.mxu1 %v550_v0 }
  0x52   :  { %406 = vmatpush3.bf16.msra.mxu0 %v405_v22 }
  0x53   :  { %407 = vmatprep.subr.bf16.mxu0 %v550_v0  ;;  %427 = vmatpush3.bf16.msra.mxu1 %v426_v44 }
  0x54   :  { %428 = vmatprep.subr.bf16.mxu1 %v550_v0 }
  0x56   :  { %409 = vmatpush3.bf16.msra.mxu0 %v408_v25 }
  0x57   :  { %430 = vmatpush3.bf16.msra.mxu1 %v429_v47 }
  0x58   :  { %431 = vmatprep.subr.bf16.mxu1 %v550_v0 }
  0x59   :  { %349 = vmatmul.mubr.f32.vlgmr.msra.gmra.mrb[0].mxu0 %v60_v26 }
  0x5b   :  { %433 = vmatpush3.bf16.msra.mxu1 %v432_v50 }
 0x12c   :  { %v150_v52 = vpop.f32.mrb[0].mxu0 }
 0x12d   :  { %v151_v53 = vadd.f32 %v278_v51, %v150_v52  ;;  %v350_v54 = vpop.f32.mrb[1].mxu0 }
 0x12f   :  { %v279_v55 = vmul.f32 -1.442695, %v151_v53 }
 0x131   :  { %443 = vpow2.f32 %v279_v55 }
 0x13b   :  { %v444_v56 = vpop.eup %443 }
 0x13c   :  { %v157_v57 = vadd.f32 1.0, %v444_v56 }
 0x13e   :  { %445 = vrcp.f32 %v157_v57 }
 0x148   :  { %v446_v58 = vpop.eup %445 }
 0x149   :  { %v160_v59 = vmul.f32 %v446_v58, %v151_v53 }
 0x14b   :  { %384 = vmatmul.mubr.f32.vlgmr.msra.gmra.mrb[0].mxu1 %v160_v59 }
 0x21e   :  { %v250_v61 = vpop.f32.mrb[0].mxu1 }
 0x21f   :  { %v251_v62 = vadd.f32 %v280_v60, %v250_v61  ;;  %v385_v63 = vpop.f32.mrb[1].mxu1 }
 0x221   :  { %v281_v0 = vmul.f32 -1.442695, %v251_v62 }
 0x223   :  { %447 = vpow2.f32 %v281_v0 }
 0x22d   :  { %v448_v1 = vpop.eup %447 }
 0x22e   :  { %v257_v2 = vadd.f32 1.0, %v448_v1 }
 0x230   :  { %449 = vrcp.f32 %v257_v2 }
 0x23a   :  { %v450_v3 = vpop.eup %449 }
 0x23b   :  { %v260_v4 = vmul.f32 %v450_v3, %v251_v62 }
 0x23d   :  { %261 = vst [vmem:[#allocation8] sm:$0x3f] %v260_v4 }
 0x23e   :  { %528 = shalt.err (!%p525_p0)
}
 0x23f   :  { %s529_s10 = scalar_lea.hbm %s665_s5, 128 }
 0x240   :  { %p530_p1 = scmp.ne.s32.totalorder %s665_s5, %s529_s10  ;;  %p533_p2 = scmp.lt.u32.totalorder %s529_s10, %s665_s5 }
 0x242   :  { %p535_p3 = pnand %p533_p2, %p530_p1 }
 0x244   :  { %538 = shalt.err (!%p535_p3)
}
 0x245   :  { %271 = dma.vmem_to_hbm [thread:$0]  %s269_s7, 128, %s665_s5, [#allocation4]  }
 0x246   :  { %543 = dma.done.wait [#allocation4], 128  }
 0x247   :  { %544 = vsyncadd [#allocation4], 4294967168 }
 0x248   :  { %275 = vsyncpa [#allocation3], 1 }
 0x249   :  { %276 = vsyncpa [#allocation6], 1 }
 0x24a   :  { %277 = vsyncpa [#allocation4], 1 }

</bundles_post_ra>
